<compile_context>
chip_gen: v7x
topology: tpu7x:2x2x1
jax: 0.10.0
libtpu: 0.0.40
codegen_flags: <defaults>
</compile_context>

<pallas_src>
import math

import jax
import jax.numpy as jnp
from jax import lax
from jax.experimental import pallas as pl
from jax.experimental.pallas import tpu as pltpu

KSIZE = 7
PAD = 3
LANES = 128
SUB = 8  # f32 sublanes per vreg


def _round_up(v, m):
    return (v + m - 1) // m * m


def _vmem_budget_bytes():
    """(block+scratch budget, scoped vmem limit), sized from the chip's VMEM."""
    try:
        cap = int(getattr(pltpu.get_tpu_info(), "vmem_capacity_bytes"))
    except Exception:
        cap = 64 << 20  # conservative default: v7x physical VMEM per TensorCore
    budget = min(cap // 4, 24 << 20)   # blocks + scratch target
    limit = min(cap // 2, 64 << 20)    # never below any generation's scoped default
    return budget, limit


def _plan_channel_max(N, C, HW, itemsize, budget_bytes):
    """Pick (c_tile, hw_band, acc_rows) for the channel-max kernel."""
    pack = (32 // (itemsize * 8)) * 8          # 8 f32 / 16 bf16 / 32 int8
    c_cands = sorted({d for d in range(pack, C + 1, pack) if C % d == 0} | {C})
    hw_cands = sorted({d for d in range(LANES, HW + 1, LANES) if HW % d == 0} | {HW},
                      reverse=True)
    if N == 1:
        # v7x megacore: keep >= 2 parallel spatial bands so a single-batch call
        # still shards across both TensorCores.
        split = [hb for hb in hw_cands if HW // hb >= 2]
        if split:
            hw_cands = split

    def rows_for(ct):
        return SUB if ct % SUB == 0 else 1

    def vmem_bytes(ct, hb):
        # double-buffered input block + double-buffered output band + accumulator
        return itemsize * (2 * ct * hb + 2 * hb + rows_for(ct) * hb)

    min_ct = c_cands[0]
    hw_band = hw_cands[-1]                     # smallest band = graceful fallback
    for hb in hw_cands:                        # largest band whose minimal tile fits
        if vmem_bytes(min_ct, hb) <= budget_bytes:
            hw_band = hb
            break
    c_tile = min_ct
    for ct in c_cands:                         # largest channel tile that still fits
        if vmem_bytes(ct, hw_band) <= budget_bytes:
            c_tile = ct
    return c_tile, hw_band, rows_for(c_tile)


def _channel_max_kernel(x_ref, o_ref, acc_ref):
    # x_ref  : (1, c_tile, hw_band)  VMEM  lane-dense channel tile of one batch elem
    # o_ref  : (1, 1, hw_band)       VMEM  max-plane band (written only at finalize)
    # acc_ref: (rows, hw_band)       VMEM  running max, kept in the input dtype
    c_idx = pl.program_id(2)
    last_c = pl.num_programs(2) - 1
    c_tile = x_ref.shape[1]
    rows = acc_ref.shape[0]

    if rows == 1:
        tile_max = jnp.max(x_ref[0], axis=0, keepdims=True)             # (1, hw)
    else:
        # Sublane-dense partial max: 8-row groups combined with pure cross-vreg
        # vmax; the single cross-sublane XLU reduce is deferred to finalize.
        tile_max = x_ref[0, 0:rows, :]
        for g in range(1, c_tile // rows):
            tile_max = jnp.maximum(tile_max, x_ref[0, g * rows:(g + 1) * rows, :])

    @pl.when(c_idx == 0)
    def _():
        acc_ref[...] = tile_max

    @pl.when(c_idx > 0)
    def _():
        acc_ref[...] = jnp.maximum(acc_ref[...], tile_max)

    @pl.when(c_idx == last_c)
    def _():
        if rows == 1:
            o_ref[0, :, :] = acc_ref[...]
        else:
            o_ref[0, :, :] = jnp.max(acc_ref[...], axis=0, keepdims=True)


def _conv7x7_sigmoid_kernel(m_ref, w_ref, o_ref, shift_ref):
    # m_ref     : (1, 1, H, W)             VMEM  channel-max plane
    # w_ref     : (KSIZE, KSIZE)           SMEM  conv weight (scalar reads)
    # o_ref     : (1, 1, H, W)             VMEM  sigmoid(conv(plane))
    # shift_ref : (KSIZE, H+2*PAD, Wc)     VMEM  7 dx-shifted zero-padded copies
    H = o_ref.shape[2]
    W = o_ref.shape[3]
    plane = m_ref[0, 0].astype(jnp.float32)                 # (H, W)

    # Build the 7 dx-shifted, zero-padded copies once; every tap below is then a
    # lane-offset-0 read with only a row offset (no per-tap lane rotates and no
    # per-row scatter from a flat accumulator).
    shift_ref[...] = jnp.zeros(shift_ref.shape, jnp.float32)
    for dx in range(KSIZE):
        dst_lo = max(0, PAD - dx)
        dst_hi = min(W, W + PAD - dx)
        src_lo = dst_lo + dx - PAD
        width = dst_hi - dst_lo
        shift_ref[dx, PAD:PAD + H, dst_lo:dst_hi] = plane[:, src_lo:src_lo + width]

    acc = jnp.zeros((H, W), jnp.float32)
    for dy in range(KSIZE):
        for dx in range(KSIZE):
            acc = acc + w_ref[dy, dx] * shift_ref[dx, dy:dy + H, 0:W]

    o_ref[0, 0] = jax.nn.sigmoid(acc).astype(o_ref.dtype)


def spatial_attention(x, w):
    """x: (N, C, H, W), w: (7, 7) -> sigmoid(conv7x7_same(max over C)), (N, 1, H, W)."""
    N, C, H, W = x.shape
    HW = H * W
    itemsize = x.dtype.itemsize
    budget, vmem_limit = _vmem_budget_bytes()
    c_tile, hw_band, rows = _plan_channel_max(N, C, HW, itemsize, budget)

    # ---- kernel 1: channel max, streamed lane-dense over (N, C, H*W) ----
    x_flat = x.reshape(N, C, HW)
    max_cost = pl.CostEstimate(
        flops=int(N * C * HW),
        transcendentals=0,
        bytes_accessed=int((N * C * HW + N * HW) * itemsize),
    )
    max_flat = pl.pallas_call(
        _channel_max_kernel,
        out_shape=jax.ShapeDtypeStruct((N, 1, HW), x.dtype),
        grid_spec=pltpu.PrefetchScalarGridSpec(
            num_scalar_prefetch=0,
            grid=(N, HW // hw_band, C // c_tile),
            in_specs=[
                pl.BlockSpec((1, c_tile, hw_band), lambda n, s, c: (n, c, s)),
            ],
            out_specs=pl.BlockSpec((1, 1, hw_band), lambda n, s, c: (n, 0, s)),
            scratch_shapes=[pltpu.VMEM((rows, hw_band), x.dtype)],
        ),
        compiler_params=pltpu.CompilerParams(
            dimension_semantics=("parallel", "parallel", "arbitrary"),
            vmem_limit_bytes=vmem_limit,
        ),
        cost_estimate=max_cost,
    )(x_flat)

    # ---- kernel 2: 7x7 "same" conv (no bias) + sigmoid on the max plane ----
    # TODO(synk): very large H*W planes would want row-band tiling with halos
    # here; one plane per grid step is ample for CBAM-sized spatial maps.
    max_plane = max_flat.reshape(N, 1, H, W)
    Wc = _round_up(W, LANES)
    conv_cost = pl.CostEstimate(
        flops=int(2 * N * HW * KSIZE * KSIZE),
        transcendentals=int(N * HW),
        bytes_accessed=int(2 * N * HW * itemsize + KSIZE * KSIZE * 4),
    )
    out = pl.pallas_call(
        _conv7x7_sigmoid_kernel,
        out_shape=jax.ShapeDtypeStruct((N, 1, H, W), x.dtype),
        grid_spec=pltpu.PrefetchScalarGridSpec(
            num_scalar_prefetch=0,
            grid=(N,),
            in_specs=[
                pl.BlockSpec((1, 1, H, W), lambda n: (n, 0, 0, 0)),
                pl.BlockSpec(memory_space=pltpu.MemorySpace.SMEM),
            ],
            out_specs=pl.BlockSpec((1, 1, H, W), lambda n: (n, 0, 0, 0)),
            scratch_shapes=[pltpu.VMEM((KSIZE, H + 2 * PAD, Wc), jnp.float32)],
        ),
        compiler_params=pltpu.CompilerParams(
            dimension_semantics=("parallel",),
            vmem_limit_bytes=vmem_limit,
        ),
        cost_estimate=conv_cost,
    )(max_plane, w.astype(jnp.float32))
    return out


if __name__ == "__main__":
    key = jax.random.PRNGKey(0)
    kx, kw = jax.random.split(key)

    # Small deterministic example: N=2, C=4, H=W=16
    N, C, H, W = 2, 4, 16, 16
    x = jax.random.normal(kx, (N, C, H, W), dtype=jnp.float32)

    # Conv2d(1, 1, 7, bias=False) weight; PyTorch init bound = 1/sqrt(fan_in) = 1/7
    bound = 1.0 / math.sqrt(KSIZE * KSIZE)
    w = jax.random.uniform(kw, (KSIZE, KSIZE), dtype=jnp.float32,
                           minval=-bound, maxval=bound)

    out = jax.block_until_ready(spatial_attention(x, w))

    # Pure-JAX reference (no torch) for sanity checking.
    m = jnp.max(x, axis=1, keepdims=True)
    ref = jax.nn.sigmoid(
        lax.conv_general_dilated(
            m, w.reshape(1, 1, KSIZE, KSIZE),
            window_strides=(1, 1), padding=[(PAD, PAD), (PAD, PAD)],
            dimension_numbers=("NCHW", "OIHW", "NCHW"),
        )
    )
    assert out.shape == (N, 1, H, W)
    assert jnp.allclose(out, ref, atol=1e-5, rtol=1e-5), "mismatch vs reference"

    print("KERNEL_OK")
</pallas_src>

<mosaic_0001>
module attributes {stable_mosaic.version = 11 : i64} {
  func.func @_channel_max_kernel(%arg0: i32, %arg1: i32, %arg2: i32, %arg3: memref<1x4x256xf32, #tpu.memory_space<vmem>>, %arg4: memref<1x1x256xf32, #tpu.memory_space<vmem>>, %arg5: memref<1x256xf32, #tpu.memory_space<vmem>>) attributes {dimension_semantics = [#tpu.dimension_semantics<parallel>, #tpu.dimension_semantics<parallel>, #tpu.dimension_semantics<arbitrary>], iteration_bounds = array<i64: 2, 1, 1>, scalar_prefetch = 0 : i64, scratch_operands = 1 : i64, tpu.core_type = #tpu.core_type<tc>, window_params = [{transform_indices = @transform_0, window_bounds = array<i64: 1, 4, 256>}, {transform_indices = @transform_1, window_bounds = array<i64: 1, 1, 256>}]} {
    %c0 = arith.constant 0 : index
    %c0_0 = arith.constant 0 : index
    %c0_1 = arith.constant 0 : index
    %0 = vector.load %arg3[%c0, %c0_0, %c0_1] : memref<1x4x256xf32, #tpu.memory_space<vmem>>, vector<1x4x256xf32>
    %1 = vector.shape_cast %0 : vector<1x4x256xf32> to vector<4x256xf32>
    %cst = arith.constant dense<0xFF800000> : vector<256xf32>
    %2 = vector.multi_reduction <maximumf>, %1, %cst [0] : vector<4x256xf32> to vector<256xf32>
    %3 = vector.shape_cast %2 : vector<256xf32> to vector<1x256xf32>
    %c0_i32 = arith.constant 0 : i32
    %4 = arith.cmpi eq, %arg2, %c0_i32 : i32
    %5 = arith.extui %4 : i1 to i32
    %c0_i32_2 = arith.constant 0 : i32
    %6 = arith.cmpi ne, %5, %c0_i32_2 : i32
    scf.if %6 {
      %c0_7 = arith.constant 0 : index
      %c0_8 = arith.constant 0 : index
      %13 = vector.load %arg5[%c0_7, %c0_8] : memref<1x256xf32, #tpu.memory_space<vmem>>, vector<1x256xf32>
      tpu.vector_store %arg5[%c0_7, %c0_8], %3 {strides = array<i32>} : memref<1x256xf32, #tpu.memory_space<vmem>>, vector<1x256xf32>,
    } else {
    }
    %c0_i32_3 = arith.constant 0 : i32
    %7 = arith.cmpi sgt, %arg2, %c0_i32_3 : i32
    %8 = arith.extui %7 : i1 to i32
    %c0_i32_4 = arith.constant 0 : i32
    %9 = arith.cmpi ne, %8, %c0_i32_4 : i32
    scf.if %9 {
      %c0_7 = arith.constant 0 : index
      %c0_8 = arith.constant 0 : index
      %13 = vector.load %arg5[%c0_7, %c0_8] : memref<1x256xf32, #tpu.memory_space<vmem>>, vector<1x256xf32>
      %14 = arith.maximumf %13, %3 : vector<1x256xf32>
      %c0_9 = arith.constant 0 : index
      %c0_10 = arith.constant 0 : index
      %15 = vector.load %arg5[%c0_9, %c0_10] : memref<1x256xf32, #tpu.memory_space<vmem>>, vector<1x256xf32>
      tpu.vector_store %arg5[%c0_9, %c0_10], %14 {strides = array<i32>} : memref<1x256xf32, #tpu.memory_space<vmem>>, vector<1x256xf32>,
    } else {
    }
    %c0_i32_5 = arith.constant 0 : i32
    %10 = arith.cmpi eq, %arg2, %c0_i32_5 : i32
    %11 = arith.extui %10 : i1 to i32
    %c0_i32_6 = arith.constant 0 : i32
    %12 = arith.cmpi ne, %11, %c0_i32_6 : i32
    scf.if %12 {
      %c0_7 = arith.constant 0 : index
      %c0_8 = arith.constant 0 : index
      %13 = vector.load %arg5[%c0_7, %c0_8] : memref<1x256xf32, #tpu.memory_space<vmem>>, vector<1x256xf32>
      %c0_9 = arith.constant 0 : index
      %c0_10 = arith.constant 0 : index
      %c0_11 = arith.constant 0 : index
      %14 = vector.load %arg4[%c0_9, %c0_10, %c0_11] : memref<1x1x256xf32, #tpu.memory_space<vmem>>, vector<1x1x256xf32>
      %15 = vector.shape_cast %14 : vector<1x1x256xf32> to vector<1x256xf32>
      %16 = vector.shape_cast %13 : vector<1x256xf32> to vector<1x1x256xf32>
      tpu.vector_store %arg4[%c0_9, %c0_10, %c0_11], %16 {strides = array<i32>} : memref<1x1x256xf32, #tpu.memory_space<vmem>>, vector<1x1x256xf32>,
    } else {
    }
    return
  }
  func.func @transform_0(%arg0: i32, %arg1: i32, %arg2: i32) -> (i32, i32, i32) {
    %c0_i32 = arith.constant 0 : i32
    return %arg0, %arg2, %arg1 : i32, i32, i32
  }
  func.func @transform_1(%arg0: i32, %arg1: i32, %arg2: i32) -> (i32, i32, i32) {
    %c0_i32 = arith.constant 0 : i32
    %c0_i32_0 = arith.constant 0 : i32
    return %arg0, %c0_i32, %arg1 : i32, i32, i32
  }
}

</mosaic_0001>

<bundles_post_ra>
// kernel: tpu_custom_call.1
= control target key start
LH: loop header
LB: loop body
LE: loop exit
PB: predicated region body
PF: predicated region fallthrough
CT: control target
= control target key end

     0   :  { %6 = vsyncpa [#allocation4], 0  ;;  %s735_s0 = inlined_call_operand.hbm [shape: f32[2,4,256], index: 0, kind: input, shape index: {}]   ;;  %s736_s1 = inlined_call_operand.hbm [shape: f32[2,1,256], index: 1, kind: output, shape index: {}]  }
   0x1   :  { %8 = vsyncpa [#allocation4 + $0x1], 0 }
   0x2   :  { %9 = vsyncpa [#allocation5], 0 }
   0x3   :  { %11 = vsyncpa [#allocation5 + $0x1], 0  ;;  %s562_s6 = smov 0   ;;  %s564_s7 = smov 0  }
   0x4   :  { %s566_s8 = smov 0   ;;  %s568_s9 = smov 0  }
   0x5   :  { %s570_s10 = smov 0   ;;  %s572_s11 = smov 0  }
   0x6 LB: > { %s354_s12 = sadd.s32 4294967295, %s547_s11   ;;  %s355_s13 = sadd.s32 4294967294, %s547_s11   ;;  %s547_s11 = sphi %s572_s11, %s17_s11   ;;  %s543_s10 = sphi %s570_s10, %s752_s10   ;;  %s539_s9 = sphi %s568_s9, %s751_s9   ;;  %s535_s8 = sphi %s566_s8, %s750_s8   ;;  %s531_s7 = sphi %s564_s7, %s749_s7   ;;  %s527_s6 = sphi %s562_s6, %s748_s6  }
   0x7   : > { %s36_s14 = sadd.s32 1, %s543_s10  ;;  %s47_s15 = sadd.s32 1, %s535_s8 }
   0x8   : > { %p38_p0 = scmp.ge.s32.totalorder %s36_s14, 2  ;;  %p54_p1 = scmp.ne.s32.totalorder %s535_s8, %s531_s7 }
   0x9   : > { %p55_p2 = scmp.eq.s32.totalorder %s547_s11, 0  ;;  %p60_p3 = scmp.ne.s32.totalorder %s531_s7, %s527_s6 }
   0xa   : > { %s754_s14 = smov (%p38_p0, %s36_s14), 0  ;;  %p61_p5 = scmp.eq.s32.totalorder %s354_s12, 0 }
   0xb   : > { %p603_p4 = por %p55_p2, %p54_p1  ;;  %s40_s17 = ssub.s32 %s543_s10, %s754_s14 }
   0xc   : > { %p86_p6 = scmp.eq.s32.totalorder %s354_s12, 1  ;;  %p45_p7 = scmp.eq.s32.totalorder %s40_s17, 0 }
   0xd   : > { %p609_p8 = por %p61_p5, %p60_p3  ;;  %p92_p10 = scmp.eq.s32.totalorder %s355_s13, 1 }
   0xe   : > { %p613_p9 = por %p86_p6, %p54_p1  ;;  %p383_p13 = scmp.lt.s32.totalorder %s547_s11, 2 }
   0xf   : > { %s618_s20 = scalar_select %p45_p7, %s535_s8, %s47_s15  }
  0x10   : > { %s740_s19 = scalar_select %p613_p9, 1, 0 }
  0x11   : > { %p620_p11 = por %p92_p10, %p60_p3  ;;  %s112_s22 = sand.u32 1, %s535_s8  }
  0x12   : > { %s358_s23 = sshll.u32 %s112_s22, 3  ;;  %s369_s24 = sshll.u32 %s543_s10, 7 }
  0x13   : > { %s741_s21 = scalar_select %p620_p11, 1, 0 }
  0x14   : > { %s631_s27 = scalar_lea.hbm %s735_s0, %s369_s24  ;;  %s116_s28 = scalar_lea.vmem [#allocation3], %s358_s23 }
  0x15   : > { %s128_s29 = sshll.u32 %s116_s28, 4  ;;  %p637_p0 = pnand %p383_p13, %p603_p4  ;;  %s633_s29 = int_to_ptr.vmem [resolvable:$true] %s128_s29 }
  0x16   : > { %s113_s2 = scalar_lea.sflag [#allocation4], %s112_s22  ;;  %s435_s3 = scalar_lea.hbm %s631_s27, 128 }
  0x17   : > { %p436_p3 = scmp.ne.s32.totalorder %s631_s27, %s435_s3  ;;  %p437_p5 = pneg %p637_p0 }
  0x18   : > { %s440_s12 = scalar_lea.hbm %s735_s0, 256  ;;  %p441_p4 = scmp.lt.u32.totalorder %s631_s27, %s735_s0 }
  0x19   : > { %p438_p6 = pnand %p437_p5, %p436_p3  ;;  %p442_p10 = scmp.lt.u32.totalorder %s440_s12, %s435_s3 }
  0x1a   : > { %p444_p12 = scmp.lt.u32.totalorder %s435_s3, %s631_s27 }
  0x1b   : > { %p439_p7 = pneg %p438_p6  ;;  %p443_p13 = por %p442_p10, %p441_p4 }
  0x1d   : > { %p445_p1 = por %p444_p12, %p443_p13 }
  0x1f   : > { %p446_p2 = pnand %p445_p1, %p439_p7 }
  0x21   : > { %449 = shalt.err (!%p446_p2)
}
  0x22   : > { %s450_s16 = scalar_lea.vmem %s633_s29, 128  ;;  %s549_s17 = smov [#allocation3]  }
  0x23   : > { %p451_p3 = scmp.ne.s32.totalorder %s633_s29, %s450_s16  ;;  %s455_s22 = sshll.u32 %s549_s17, 4  ;;  %s456_s22 = int_to_ptr.vmem [resolvable:$false] %s455_s22 }
  0x24   : > { %s457_s23 = scalar_lea.vmem %s456_s22, 256  ;;  %p458_p9 = scmp.lt.s32.totalorder %s633_s29, %s456_s22 }
  0x25   : > { %p453_p6 = pnand %p451_p3, %p437_p5  ;;  %p459_p4 = scmp.lt.s32.totalorder %s457_s23, %s450_s16 }
  0x27   : > { %p454_p11 = pneg %p453_p6  ;;  %p460_p10 = por %p459_p4, %p458_p9 }
  0x29   : > { %p461_p12 = pnand %p460_p10, %p454_p11 }
  0x2b   : > { %464 = shalt.err (!%p461_p12)
}
  0x2c   : > { %378 = dma.hbm_to_vmem [thread:$0]  (!%p637_p0), %s631_s27, 128, %s633_s29, %s113_s2  }
  0x2d   : > { %p743_p1 = scmp.lt.s32.totalorder %s547_s11, 3  ;;  %p744_p2 = scmp.ge.s32.totalorder %s547_s11, 1 }
  0x2f   : > { %p134_p5 = pnand %p744_p2, %p743_p1 }
  0x30   : > { %s673_s24 = sand.u32 (!%p134_p5), 1, %s531_s7  }
  0x31   : > { %137 = sbr.rel (%p134_p5) target bundleno = 101 (0x65), region = 24  ;;  %s362_s25 = sshll.u32 (!%p134_p5), %s673_s24, 3 }
  0x32   : > { %s140_s26 = scalar_lea.sflag (!%p134_p5), [#allocation4], %s673_s24  ;;  %s143_s28 = scalar_lea.vmem (!%p134_p5), [#allocation3], %s362_s25 }
  0x38   : > { %518 = dma.done.wait (%p609_p8), %s140_s26, 128  }
  0x39   : > { %520 = vsyncadd (%p609_p8), %s140_s26, 4294967168  ;;  %vm168_vm0 = vcmask 1043456   ;;  %v164_v0 = vld [vmem:[%s143_s28] sm:$0xff]  ;;  %v550_v9 = vmov 1966171168   ;;  %v193_v11 = vlaneseq  ;;  %s363_s18 = sshll.u32 %s673_s24, 1 }
  0x3a   : > { %v166_v1 = vcombine.high %v164_v0, %v164_v0  ;;  %v169_v2 = vsel %vm168_vm0, %v164_v0, -inf  ;;  %v191_v10 = vunpack.c.l.s4 %v550_v9  ;;  %s161_s27 = scalar_lea.vmem [#allocation6], %s363_s18  ;;  %s370_s30 = sshll.u32 %s539_s9, 5 }
  0x3b   : > { %v170_v3 = vrot.slane %v169_v2, 4  ;;  %v194_v17 = vshrl.u32 %v193_v11, 7  ;;  %vm207_vm1 = vcmp.lt.s32.totalorder %v193_v11, 256  ;;  %s265_s29 = sshll.u32 %s161_s27, 4  ;;  %s688_s4 = scalar_lea.hbm %s736_s1, %s370_s30  ;;  %s683_s29 = int_to_ptr.vmem [resolvable:$true] %s265_s29 }
  0x3c   : > { %v176_v4 = vsel %vm168_vm0, %v166_v1, -inf  ;;  %v192_v16 = vunpack.c.0.s8 %v191_v10  ;;  %s249_s5 = scalar_lea.sflag [#allocation5], %s673_s24  ;;  %s465_s12 = scalar_lea.vmem %s683_s29, 32 }
  0x3d   : > { %v171_v5 = vmax.f32 %v169_v2, %v170_v3  ;;  %v177_v6 = vrot.slane %v176_v4, 4  ;;  %p466_p8 = scmp.ne.s32.totalorder %s683_s29, %s465_s12  ;;  %p745_p9 = scmp.ne.s32.totalorder %s740_s19, 0 }
  0x3e   : > { %v195_v21 = vsub.s32 %v192_v16, %v194_v17  ;;  %s551_s13 = smov [#allocation6]  }
  0x3f   : > { %v172_v7 = vrot.slane %v171_v5, 2  ;;  %v178_v8 = vmax.f32 %v176_v4, %v177_v6  ;;  %p467_p11 = pnand %p466_p8, %p745_p9  ;;  %s469_s9 = sshll.u32 %s551_s13, 4  ;;  %s470_s9 = int_to_ptr.vmem [resolvable:$false] %s469_s9 }
  0x40   : > { %s471_s15 = scalar_lea.vmem %s470_s9, 64  ;;  %p472_p7 = scmp.lt.s32.totalorder %s683_s29, %s470_s9 }
  0x41   : > { %v173_v12 = vmax.f32 %v171_v5, %v172_v7  ;;  %v179_v13 = vrot.slane %v178_v8, 2  ;;  %p468_p0 = pneg %p467_p11  ;;  %p473_p13 = scmp.lt.s32.totalorder %s471_s15, %s465_s12 }
  0x43   : > { %v174_v14 = vrot.slane %v173_v12, 1  ;;  %v180_v15 = vmax.f32 %v178_v8, %v179_v13  ;;  %p474_p3 = por %p473_p13, %p472_p7 }
  0x45   : > { %v175_v18 = vmax.f32 %v173_v12, %v174_v14  ;;  %v181_v19 = vrot.slane %v180_v15, 1  ;;  %p475_p6 = pnand %p474_p3, %p468_p0 }
  0x47   : > { %v182_v20 = vmax.f32 %v180_v15, %v181_v19 }
  0x49   : > { %v189_v22 = vcombine.low %v175_v18, %v182_v20 }
  0x4b   : > { %v196_v23 = vrot.slane %v189_v22, %v195_v21 }
  0x4d   : > { %v203_v24 = vrot.slane %v196_v23, %v195_v21 }
  0x4f   : > { %209 = vst.msk [vmem:[#allocation2] sm:$0x3] %vm207_vm1, %v203_v24 }
  0x56   : > { %v242_v25 = vld [vmem:[#allocation2] sm:$0x3] }
  0x57   : > { %247 = vst.msk [vmem:[%s161_s27] sm:$0x3] %vm207_vm1, %v242_v25 }
  0x58   : > { %478 = shalt.err (!%p475_p6)
}
  0x59   : > { %s479_s16 = scalar_lea.hbm %s688_s4, 32  ;;  %s483_s23 = scalar_lea.hbm %s736_s1, 64 }
  0x5a   : > { %p480_p4 = scmp.ne.s32.totalorder %s688_s4, %s479_s16  ;;  %p484_p1 = scmp.lt.u32.totalorder %s688_s4, %s736_s1 }
  0x5b   : > { %p485_p2 = scmp.lt.u32.totalorder %s483_s23, %s479_s16  ;;  %p487_p8 = scmp.lt.u32.totalorder %s479_s16, %s688_s4 }
  0x5c   : > { %p481_p10 = pnand %p480_p4, %p745_p9 }
  0x5d   : > { %p486_p5 = por %p485_p2, %p484_p1 }
  0x5e   : > { %p482_p12 = pneg %p481_p10 }
  0x5f   : > { %p488_p11 = por %p487_p8, %p486_p5 }
  0x61   : > { %p489_p0 = pnand %p488_p11, %p482_p12 }
  0x63   : > { %492 = shalt.err (!%p489_p0)
}
  0x64   : > { %373 = dma.vmem_to_hbm [thread:$0]  (%p745_p9), %s683_s29, 32, %s688_s4, %s249_s5  }
  0x65 PF: > { %s277_s26 = sand.u32 1, %s527_s6   ;;  %p746_p7 = scmp.ne.s32.totalorder %s741_s21, 0 }
  0x66   : > { %p747_p13 = scmp.ge.s32.totalorder %s547_s11, 2  ;;  %s278_s28 = scalar_lea.sflag [#allocation5], %s277_s26 }
  0x68   : > { %p380_p3 = pnand %p747_p13, %p746_p7 }
  0x6a   : > { %522 = dma.done.wait (!%p380_p3), %s278_s28, 32  }
  0x6b   : > { %524 = vsyncadd (!%p380_p3), %s278_s28, 4294967264  ;;  %s17_s11 = sadd.s32 1, %s547_s11   ;;  %s748_s6 = smov %s531_s7 }
  0x6c   : > { %p14_p6 = scmp.ge.s32.totalorder %s17_s11, 4   ;;  %s749_s7 = smov %s535_s8 }
  0x6d   : > { %s750_s8 = smov %s618_s20  ;;  %s751_s9 = smov %s543_s10 }
  0x6e   : > { %s752_s10 = smov %s754_s14  ;;  %16 = sbr.rel (!%p14_p6) target bundleno = 6 (0x6), region = 81 }
  0x75   :  { %283 = vsyncpa [#allocation4], 1 }
  0x76   :  { %285 = vsyncpa [#allocation4 + $0x1], 1 }
  0x77   :  { %286 = vsyncpa [#allocation5], 1 }
  0x78   :  { %288 = vsyncpa [#allocation5 + $0x1], 1 }

</bundles_post_ra>
